<compile_context>
chip_gen: v7x
topology: tpu7x:2x2x1
jax: 0.10.0
libtpu: 0.0.40
codegen_flags: <defaults>
</compile_context>

<pallas_src>
import jax
import jax.numpy as jnp
from jax.experimental import pallas as pl
from jax.experimental.pallas import tpu as pltpu


# -----------------------------------------------------------------------------
# helpers / config
# -----------------------------------------------------------------------------
def _round_up(x: int, m: int) -> int:
    return ((x + m - 1) // m) * m


def _pad_to(a, shape):
    return jnp.pad(a, [(0, t - s) for s, t in zip(a.shape, shape)])


_STREAM_TILE_K = 8192          # K tile for the streaming path
_RESIDENT_K_MAX = 8192         # up to this (128-aligned) K, wf stays resident
_VMEM_LIMIT = 48 * 1024 * 1024  # explicit scoped-VMEM budget (v7x-safe)


def _pick_tile_b(B: int) -> int:
    """Sublane-multiple batch tile; >=2 tiles when batch allows (v7x 2 TCs)."""
    b16 = _round_up(B, 16)
    if b16 <= 128:
        return b16
    half = _round_up((b16 + 1) // 2, 16)
    return min(256, half)


# -----------------------------------------------------------------------------
# kernels
# -----------------------------------------------------------------------------
def _mlp_head(feat_f32, w1_ref, b1_ref, w2_ref, b2_ref, w3_ref, b3_ref, out_dtype):
    """(Linear -> ReLU -> Dropout(id)) x2 -> Linear; bf16 MXU inputs, f32 accum."""
    h1 = jnp.dot(feat_f32.astype(jnp.bfloat16), w1_ref[...],
                 preferred_element_type=jnp.float32) + b1_ref[...]
    h1 = jnp.maximum(h1, 0.0)
    h2 = jnp.dot(h1.astype(jnp.bfloat16), w2_ref[...],
                 preferred_element_type=jnp.float32) + b2_ref[...]
    h2 = jnp.maximum(h2, 0.0)
    logits = jnp.dot(h2.astype(jnp.bfloat16), w3_ref[...],
                     preferred_element_type=jnp.float32) + b3_ref[...]
    return logits.astype(out_dtype)


def _resident_kernel(x_ref, wf_ref, bf_ref, w1_ref, b1_ref, w2_ref, b2_ref,
                     w3_ref, b3_ref, out_ref):
    # Full-K projection in one shot; x is streamed as f32 and cast here.
    feat = jnp.dot(x_ref[...].astype(jnp.bfloat16), wf_ref[...],
                   preferred_element_type=jnp.float32) + bf_ref[...]
    out_ref[...] = _mlp_head(feat, w1_ref, b1_ref, w2_ref, b2_ref,
                             w3_ref, b3_ref, out_ref.dtype)


def _streaming_kernel(x_ref, wf_ref, bf_ref, w1_ref, b1_ref, w2_ref, b2_ref,
                      w3_ref, b3_ref, out_ref, acc_ref):
    k = pl.program_id(1)

    @pl.when(k == 0)
    def _init():
        acc_ref[...] = jnp.zeros_like(acc_ref)

    # K-streamed projection: f32 tile cast to bf16 in-kernel, f32 accumulation.
    acc_ref[...] += jnp.dot(x_ref[...].astype(jnp.bfloat16), wf_ref[...],
                            preferred_element_type=jnp.float32)

    @pl.when(k == pl.num_programs(1) - 1)
    def _epilogue():
        feat = acc_ref[...] + bf_ref[...]
        out_ref[...] = _mlp_head(feat, w1_ref, b1_ref, w2_ref, b2_ref,
                                 w3_ref, b3_ref, out_ref.dtype)


# -----------------------------------------------------------------------------
# one-time weight preparation (frozen backbone stand-in + head)
# -----------------------------------------------------------------------------
def prepare_frozen_params(params):
    """Pad / cast the frozen weights once, outside the per-step forward."""
    wf, bf, w1, b1, w2, b2, w3, b3 = params
    in_dim, clip_dim = wf.shape
    h1_dim = w1.shape[1]
    h2_dim = w2.shape[1]
    num_classes = w3.shape[1]

    clip_pad = _round_up(clip_dim, 128)
    nc_pad = _round_up(num_classes, 128)
    k128 = _round_up(in_dim, 128)
    if k128 <= _RESIDENT_K_MAX:
        streaming, tile_k, k_pad = False, k128, k128
    else:
        streaming, tile_k = True, _STREAM_TILE_K
        k_pad = _round_up(in_dim, tile_k)

    f32, bf16 = jnp.float32, jnp.bfloat16
    wf_p = _pad_to(wf.astype(f32), (k_pad, clip_pad)).astype(bf16)
    bf_p = _pad_to(bf.astype(f32).reshape(1, -1), (1, clip_pad))
    w1_p = _pad_to(w1.astype(f32), (clip_pad, h1_dim)).astype(bf16)
    b1_p = b1.astype(f32).reshape(1, -1)
    w2_p = w2.astype(bf16)
    b2_p = b2.astype(f32).reshape(1, -1)
    w3_p = _pad_to(w3.astype(f32), (h2_dim, nc_pad)).astype(bf16)
    b3_p = _pad_to(b3.astype(f32).reshape(1, -1), (1, nc_pad))

    weights = tuple(jax.device_put(w) for w in
                    (wf_p, bf_p, w1_p, b1_p, w2_p, b2_p, w3_p, b3_p))
    meta = dict(in_dim=in_dim, clip_pad=clip_pad, nc_pad=nc_pad,
                num_classes=num_classes, h1_dim=h1_dim, h2_dim=h2_dim,
                k_pad=k_pad, tile_k=tile_k, streaming=streaming)
    return weights, meta


# -----------------------------------------------------------------------------
# forward wrapper
# -----------------------------------------------------------------------------
def custom_clip_forward(image_nchw, prepared):
    """Forward pass. image_nchw: [B, C, H, W] float32."""
    weights, meta = prepared
    wf_p, bf_p, w1_p, b1_p, w2_p, b2_p, w3_p, b3_p = weights
    B = image_nchw.shape[0]
    in_dim = meta["in_dim"]
    clip_pad, nc_pad = meta["clip_pad"], meta["nc_pad"]
    h1_dim, h2_dim = meta["h1_dim"], meta["h2_dim"]
    k_pad, tile_k = meta["k_pad"], meta["tile_k"]
    f32 = jnp.float32

    # Glue: flatten NCHW image to [B, in_dim] (stand-in backbone input).
    x_flat = image_nchw.reshape(B, -1).astype(f32)
    assert x_flat.shape[1] == in_dim

    tile_b = _pick_tile_b(B)
    b_pad = _round_up(B, tile_b)
    # Only the (small) batch / K tails are zero-padded; no wrapper-side bf16
    # cast and no 128-row batch inflation.
    x_p = _pad_to(x_flat, (b_pad, k_pad))

    head_flops = 2 * b_pad * (clip_pad * h1_dim + h1_dim * h2_dim + h2_dim * nc_pad)
    flops = 2 * b_pad * k_pad * clip_pad + head_flops
    bytes_accessed = (4 * x_p.size
                      + 2 * (wf_p.size + w1_p.size + w2_p.size + w3_p.size)
                      + 4 * (bf_p.size + b1_p.size + b2_p.size + b3_p.size)
                      + 4 * b_pad * nc_pad)
    cost = pl.CostEstimate(flops=int(flops), transcendentals=0,
                           bytes_accessed=int(bytes_accessed))

    # Head weights / biases: constant index_map -> DMA'd once, VMEM-resident.
    head_specs = [
        pl.BlockSpec((1, clip_pad), lambda *a: (0, 0)),
        pl.BlockSpec((clip_pad, h1_dim), lambda *a: (0, 0)),
        pl.BlockSpec((1, h1_dim), lambda *a: (0, 0)),
        pl.BlockSpec((h1_dim, h2_dim), lambda *a: (0, 0)),
        pl.BlockSpec((1, h2_dim), lambda *a: (0, 0)),
        pl.BlockSpec((h2_dim, nc_pad), lambda *a: (0, 0)),
        pl.BlockSpec((1, nc_pad), lambda *a: (0, 0)),
    ]

    if not meta["streaming"]:
        # Small in_dim: projection weight fully resident, no K axis / scratch.
        grid_spec = pltpu.PrefetchScalarGridSpec(
            num_scalar_prefetch=0,
            grid=(b_pad // tile_b,),
            in_specs=[pl.BlockSpec((tile_b, k_pad), lambda i: (i, 0)),
                      pl.BlockSpec((k_pad, clip_pad), lambda i: (0, 0)),
                      *head_specs],
            out_specs=pl.BlockSpec((tile_b, nc_pad), lambda i: (i, 0)),
        )
        kernel = _resident_kernel
        dims = ("parallel",)
    else:
        # Large in_dim: stream x and wf over K with deep pipelining.
        grid_spec = pltpu.PrefetchScalarGridSpec(
            num_scalar_prefetch=0,
            grid=(b_pad // tile_b, k_pad // tile_k),
            in_specs=[pl.BlockSpec((tile_b, tile_k), lambda i, k: (i, k),
                                   pipeline_mode=pl.Buffered(3)),
                      pl.BlockSpec((tile_k, clip_pad), lambda i, k: (k, 0),
                                   pipeline_mode=pl.Buffered(3)),
                      *head_specs],
            out_specs=pl.BlockSpec((tile_b, nc_pad), lambda i, k: (i, 0)),
            scratch_shapes=[pltpu.VMEM((tile_b, clip_pad), f32)],
        )
        kernel = _streaming_kernel
        dims = ("parallel", "arbitrary")

    out_padded = pl.pallas_call(
        kernel,
        out_shape=jax.ShapeDtypeStruct((b_pad, nc_pad), f32),
        grid_spec=grid_spec,
        compiler_params=pltpu.CompilerParams(
            dimension_semantics=dims,
            vmem_limit_bytes=_VMEM_LIMIT),
        cost_estimate=cost,
    )(x_p, wf_p, bf_p, w1_p, b1_p, w2_p, b2_p, w3_p, b3_p)

    # Strip batch / class padding.
    return out_padded[:B, :meta["num_classes"]]


# -----------------------------------------------------------------------------
# deterministic parameter init (shapes follow the module __init__,
# at small synthetic scale: clip_output_dim=32, num_classes=8)
# -----------------------------------------------------------------------------
def init_params(key, in_dim, clip_dim=32, h1=512, h2=256, num_classes=8):
    ks = jax.random.split(key, 8)

    def lin(kw, kb, fan_in, fan_out):
        scale = 1.0 / jnp.sqrt(fan_in)
        w = jax.random.uniform(kw, (fan_in, fan_out), jnp.float32, -scale, scale)
        b = jax.random.uniform(kb, (1, fan_out), jnp.float32, -scale, scale)
        return w, b

    wf, bf = lin(ks[0], ks[1], in_dim, clip_dim)     # stand-in CLIP projection
    w1, b1 = lin(ks[2], ks[3], clip_dim, h1)         # Linear(clip_dim, 512)
    w2, b2 = lin(ks[4], ks[5], h1, h2)               # Linear(512, 256)
    w3, b3 = lin(ks[6], ks[7], h2, num_classes)      # Linear(256, num_classes)
    return (wf, bf, w1, b1, w2, b2, w3, b3)


if __name__ == "__main__":
    key = jax.random.PRNGKey(0)
    k_img, k_par = jax.random.split(key)

    # Small synthetic shapes: batch=2, 3-channel image, 16x16 spatial.
    B, C, H, W = 2, 3, 16, 16
    image = jax.random.normal(k_img, (B, C, H, W), jnp.float32)

    params = init_params(k_par, in_dim=C * H * W,
                         clip_dim=32, h1=512, h2=256, num_classes=8)
    prepared = prepare_frozen_params(params)   # one-time pad/cast of frozen weights

    out = jax.block_until_ready(custom_clip_forward(image, prepared))

    # Pure-JAX reference using the SAME prepared bf16 weights and f32
    # accumulation (dropout = identity at inference), so the check isolates
    # kernel bugs rather than dtype policy.
    weights, meta = prepared
    wf_p, bf_p, w1_p, b1_p, w2_p, b2_p, w3_p, b3_p = weights
    x_flat = image.reshape(B, -1)
    x_pad = jnp.pad(x_flat, ((0, 0), (0, meta["k_pad"] - meta["in_dim"])))
    feat = jnp.dot(x_pad.astype(jnp.bfloat16), wf_p,
                   preferred_element_type=jnp.float32) + bf_p
    h = jnp.maximum(jnp.dot(feat.astype(jnp.bfloat16), w1_p,
                            preferred_element_type=jnp.float32) + b1_p, 0.0)
    h = jnp.maximum(jnp.dot(h.astype(jnp.bfloat16), w2_p,
                            preferred_element_type=jnp.float32) + b2_p, 0.0)
    ref = (jnp.dot(h.astype(jnp.bfloat16), w3_p,
                   preferred_element_type=jnp.float32) + b3_p)[:, :8]

    assert out.shape == (B, 8), out.shape
    max_diff = jnp.max(jnp.abs(out - ref))
    assert jnp.allclose(out, ref, atol=2e-2, rtol=2e-2), \
        f"mismatch vs reference, max abs diff {max_diff}"

    print("KERNEL_OK")
</pallas_src>

<mosaic_0001>
module attributes {stable_mosaic.version = 11 : i64} {
  func.func @_resident_kernel(%arg0: i32, %arg1: memref<16x768xf32, #tpu.memory_space<vmem>>, %arg2: memref<768x128xbf16, #tpu.memory_space<vmem>>, %arg3: memref<1x128xf32, #tpu.memory_space<vmem>>, %arg4: memref<128x512xbf16, #tpu.memory_space<vmem>>, %arg5: memref<1x512xf32, #tpu.memory_space<vmem>>, %arg6: memref<512x256xbf16, #tpu.memory_space<vmem>>, %arg7: memref<1x256xf32, #tpu.memory_space<vmem>>, %arg8: memref<256x128xbf16, #tpu.memory_space<vmem>>, %arg9: memref<1x128xf32, #tpu.memory_space<vmem>>, %arg10: memref<16x128xf32, #tpu.memory_space<vmem>>) attributes {dimension_semantics = [#tpu.dimension_semantics<parallel>], iteration_bounds = array<i64: 1>, scalar_prefetch = 0 : i64, scratch_operands = 0 : i64, tpu.core_type = #tpu.core_type<tc>, window_params = [{transform_indices = @transform_0, window_bounds = array<i64: 16, 768>}, {pipeline_mode = #tpu.pipeline_mode<synchronous>, transform_indices = @transform_1, window_bounds = array<i64: 768, 128>}, {pipeline_mode = #tpu.pipeline_mode<synchronous>, transform_indices = @transform_2, window_bounds = array<i64: 1, 128>}, {pipeline_mode = #tpu.pipeline_mode<synchronous>, transform_indices = @transform_3, window_bounds = array<i64: 128, 512>}, {pipeline_mode = #tpu.pipeline_mode<synchronous>, transform_indices = @transform_4, window_bounds = array<i64: 1, 512>}, {pipeline_mode = #tpu.pipeline_mode<synchronous>, transform_indices = @transform_5, window_bounds = array<i64: 512, 256>}, {pipeline_mode = #tpu.pipeline_mode<synchronous>, transform_indices = @transform_6, window_bounds = array<i64: 1, 256>}, {pipeline_mode = #tpu.pipeline_mode<synchronous>, transform_indices = @transform_7, window_bounds = array<i64: 256, 128>}, {pipeline_mode = #tpu.pipeline_mode<synchronous>, transform_indices = @transform_8, window_bounds = array<i64: 1, 128>}, {transform_indices = @transform_9, window_bounds = array<i64: 16, 128>}]} {
    %c0 = arith.constant 0 : index
    %c0_0 = arith.constant 0 : index
    %0 = vector.load %arg1[%c0, %c0_0] : memref<16x768xf32, #tpu.memory_space<vmem>>, vector<16x768xf32>
    %1 = arith.truncf %0 : vector<16x768xf32> to vector<16x768xbf16>
    %c0_1 = arith.constant 0 : index
    %c0_2 = arith.constant 0 : index
    %2 = vector.load %arg2[%c0_1, %c0_2] : memref<768x128xbf16, #tpu.memory_space<vmem>>, vector<768x128xbf16>
    %cst = arith.constant dense<0.000000e+00> : vector<16x128xf32>
    %3 = tpu.matmul %1, %2, %cst {dimension_numbers = #tpu.dot_dimension_numbers<[1], [0], [0], [1], [0, 0, 1, 1], [], []>} : vector<16x768xbf16>, vector<768x128xbf16>, vector<16x128xf32> -> vector<16x128xf32>
    %c0_3 = arith.constant 0 : index
    %c0_4 = arith.constant 0 : index
    %4 = vector.load %arg3[%c0_3, %c0_4] : memref<1x128xf32, #tpu.memory_space<vmem>>, vector<1x128xf32>
    %5 = vector.broadcast %4 : vector<1x128xf32> to vector<16x128xf32>
    %6 = arith.addf %3, %5 : vector<16x128xf32>
    %7 = arith.truncf %6 : vector<16x128xf32> to vector<16x128xbf16>
    %c0_5 = arith.constant 0 : index
    %c0_6 = arith.constant 0 : index
    %8 = vector.load %arg4[%c0_5, %c0_6] : memref<128x512xbf16, #tpu.memory_space<vmem>>, vector<128x512xbf16>
    %cst_7 = arith.constant dense<0.000000e+00> : vector<16x512xf32>
    %9 = tpu.matmul %7, %8, %cst_7 {dimension_numbers = #tpu.dot_dimension_numbers<[1], [0], [0], [1], [0, 0, 1, 1], [], []>} : vector<16x128xbf16>, vector<128x512xbf16>, vector<16x512xf32> -> vector<16x512xf32>
    %c0_8 = arith.constant 0 : index
    %c0_9 = arith.constant 0 : index
    %10 = vector.load %arg5[%c0_8, %c0_9] : memref<1x512xf32, #tpu.memory_space<vmem>>, vector<1x512xf32>
    %11 = vector.broadcast %10 : vector<1x512xf32> to vector<16x512xf32>
    %12 = arith.addf %9, %11 : vector<16x512xf32>
    %cst_10 = arith.constant 0.000000e+00 : f32
    %13 = vector.broadcast %cst_10 : f32 to vector<16x512xf32>
    %14 = arith.maximumf %12, %13 : vector<16x512xf32>
    %15 = arith.truncf %14 : vector<16x512xf32> to vector<16x512xbf16>
    %c0_11 = arith.constant 0 : index
    %c0_12 = arith.constant 0 : index
    %16 = vector.load %arg6[%c0_11, %c0_12] : memref<512x256xbf16, #tpu.memory_space<vmem>>, vector<512x256xbf16>
    %cst_13 = arith.constant dense<0.000000e+00> : vector<16x256xf32>
    %17 = tpu.matmul %15, %16, %cst_13 {dimension_numbers = #tpu.dot_dimension_numbers<[1], [0], [0], [1], [0, 0, 1, 1], [], []>} : vector<16x512xbf16>, vector<512x256xbf16>, vector<16x256xf32> -> vector<16x256xf32>
    %c0_14 = arith.constant 0 : index
    %c0_15 = arith.constant 0 : index
    %18 = vector.load %arg7[%c0_14, %c0_15] : memref<1x256xf32, #tpu.memory_space<vmem>>, vector<1x256xf32>
    %19 = vector.broadcast %18 : vector<1x256xf32> to vector<16x256xf32>
    %20 = arith.addf %17, %19 : vector<16x256xf32>
    %cst_16 = arith.constant 0.000000e+00 : f32
    %21 = vector.broadcast %cst_16 : f32 to vector<16x256xf32>
    %22 = arith.maximumf %20, %21 : vector<16x256xf32>
    %23 = arith.truncf %22 : vector<16x256xf32> to vector<16x256xbf16>
    %c0_17 = arith.constant 0 : index
    %c0_18 = arith.constant 0 : index
    %24 = vector.load %arg8[%c0_17, %c0_18] : memref<256x128xbf16, #tpu.memory_space<vmem>>, vector<256x128xbf16>
    %cst_19 = arith.constant dense<0.000000e+00> : vector<16x128xf32>
    %25 = tpu.matmul %23, %24, %cst_19 {dimension_numbers = #tpu.dot_dimension_numbers<[1], [0], [0], [1], [0, 0, 1, 1], [], []>} : vector<16x256xbf16>, vector<256x128xbf16>, vector<16x128xf32> -> vector<16x128xf32>
    %c0_20 = arith.constant 0 : index
    %c0_21 = arith.constant 0 : index
    %26 = vector.load %arg9[%c0_20, %c0_21] : memref<1x128xf32, #tpu.memory_space<vmem>>, vector<1x128xf32>
    %27 = vector.broadcast %26 : vector<1x128xf32> to vector<16x128xf32>
    %28 = arith.addf %25, %27 : vector<16x128xf32>
    %c0_22 = arith.constant 0 : index
    %c0_23 = arith.constant 0 : index
    %29 = vector.load %arg10[%c0_22, %c0_23] : memref<16x128xf32, #tpu.memory_space<vmem>>, vector<16x128xf32>
    tpu.vector_store %arg10[%c0_22, %c0_23], %28 {strides = array<i32>} : memref<16x128xf32, #tpu.memory_space<vmem>>, vector<16x128xf32>,
    return
  }
  func.func @transform_0(%arg0: i32) -> (i32, i32) {
    %c0_i32 = arith.constant 0 : i32
    %c0_i32_0 = arith.constant 0 : i32
    return %arg0, %c0_i32 : i32, i32
  }
  func.func @transform_1(%arg0: i32) -> (i32, i32) {
    %c0_i32 = arith.constant 0 : i32
    %c0_i32_0 = arith.constant 0 : i32
    %c0_i32_1 = arith.constant 0 : i32
    return %c0_i32, %c0_i32_0 : i32, i32
  }
  func.func @transform_2(%arg0: i32) -> (i32, i32) {
    %c0_i32 = arith.constant 0 : i32
    %c0_i32_0 = arith.constant 0 : i32
    %c0_i32_1 = arith.constant 0 : i32
    return %c0_i32, %c0_i32_0 : i32, i32
  }
  func.func @transform_3(%arg0: i32) -> (i32, i32) {
    %c0_i32 = arith.constant 0 : i32
    %c0_i32_0 = arith.constant 0 : i32
    %c0_i32_1 = arith.constant 0 : i32
    return %c0_i32, %c0_i32_0 : i32, i32
  }
  func.func @transform_4(%arg0: i32) -> (i32, i32) {
    %c0_i32 = arith.constant 0 : i32
    %c0_i32_0 = arith.constant 0 : i32
    %c0_i32_1 = arith.constant 0 : i32
    return %c0_i32, %c0_i32_0 : i32, i32
  }
  func.func @transform_5(%arg0: i32) -> (i32, i32) {
    %c0_i32 = arith.constant 0 : i32
    %c0_i32_0 = arith.constant 0 : i32
    %c0_i32_1 = arith.constant 0 : i32
    return %c0_i32, %c0_i32_0 : i32, i32
  }
  func.func @transform_6(%arg0: i32) -> (i32, i32) {
    %c0_i32 = arith.constant 0 : i32
    %c0_i32_0 = arith.constant 0 : i32
    %c0_i32_1 = arith.constant 0 : i32
    return %c0_i32, %c0_i32_0 : i32, i32
  }
  func.func @transform_7(%arg0: i32) -> (i32, i32) {
    %c0_i32 = arith.constant 0 : i32
    %c0_i32_0 = arith.constant 0 : i32
    %c0_i32_1 = arith.constant 0 : i32
    return %c0_i32, %c0_i32_0 : i32, i32
  }
  func.func @transform_8(%arg0: i32) -> (i32, i32) {
    %c0_i32 = arith.constant 0 : i32
    %c0_i32_0 = arith.constant 0 : i32
    %c0_i32_1 = arith.constant 0 : i32
    return %c0_i32, %c0_i32_0 : i32, i32
  }
  func.func @transform_9(%arg0: i32) -> (i32, i32) {
    %c0_i32 = arith.constant 0 : i32
    %c0_i32_0 = arith.constant 0 : i32
    return %arg0, %c0_i32 : i32, i32
  }
}

</mosaic_0001>

<bundles_post_ra>
// kernel: tpu_custom_call.1
= control target key start
LH: loop header
LB: loop body
LE: loop exit
PB: predicated region body
PF: predicated region fallthrough
CT: control target
= control target key end

     0   :  { %14 = vsyncpa [#allocation3], 0  ;;  %s2431_s0 = inlined_call_operand.hbm [shape: f32[16,768], index: 0, kind: input, shape index: {}]   ;;  %s2432_s1 = inlined_call_operand.hbm [shape: bf16[768,128], index: 1, kind: input, shape index: {}]   ;;  %s2433_s2 = inlined_call_operand.vmem [shape: f32[1,128], index: 2, kind: input, shape index: {}]   ;;  %s2434_s3 = inlined_call_operand.hbm [shape: bf16[128,512], index: 3, kind: input, shape index: {}]   ;;  %s2435_s4 = inlined_call_operand.vmem [shape: f32[1,512], index: 4, kind: input, shape index: {}]   ;;  %s2436_s5 = inlined_call_operand.hbm [shape: bf16[512,256], index: 5, kind: input, shape index: {}]   ;;  %s2437_s6 = inlined_call_operand.vmem [shape: f32[1,256], index: 6, kind: input, shape index: {}]   ;;  %s2438_s7 = inlined_call_operand.hbm [shape: bf16[256,128], index: 7, kind: input, shape index: {}]   ;;  %s2439_s8 = inlined_call_operand.vmem [shape: f32[1,128], index: 8, kind: input, shape index: {}]   ;;  %s2440_s9 = inlined_call_operand.hbm [shape: f32[16,128], index: 9, kind: output, shape index: {}]  }
   0x1   :  { %15 = vsyncpa [#allocation6], 0 }
   0x2   :  { %16 = vsyncpa [#allocation9], 0 }
   0x3   :  { %17 = vsyncpa [#allocation4], 0  ;;  %s2253_s30 = smov [#allocation5]   ;;  %s2113_s13 = scalar_lea.hbm %s2432_s1, 6144 }
   0x4   :  { %s35_s10 = sshll.u32 %s2253_s30, 4  ;;  %p2114_p0 = scmp.ne.s32.totalorder %s2432_s1, %s2113_s13  ;;  %s36_s10 = int_to_ptr.vmem [resolvable:$true] %s35_s10 }
   0x5   :  { %p2117_p1 = scmp.lt.u32.totalorder %s2113_s13, %s2432_s1 }
   0x7   :  { %p2119_p2 = pnand %p2117_p1, %p2114_p0 }
   0x9   :  { %2122 = shalt.err (!%p2119_p2)
}
   0xa   :  { %s2123_s18 = scalar_lea.vmem %s36_s10, 6144  ;;  %p2128_p4 = scmp.lt.s32.totalorder %s36_s10, %s36_s10 }
   0xb   :  { %p2124_p3 = scmp.ne.s32.totalorder %s36_s10, %s2123_s18  ;;  %p2129_p5 = scmp.lt.s32.totalorder %s2123_s18, %s2123_s18 }
   0xd   :  { %p2130_p6 = por %p2129_p5, %p2128_p4 }
   0xf   :  { %p2131_p7 = pnand %p2130_p6, %p2124_p3 }
  0x11   :  { %2134 = shalt.err (!%p2131_p7)
}
  0x12   :  { %s2254_s19 = smov 64   ;;  %s2255_s20 = smov 4  }
  0x13   :  { %41 = dma.hbm_to_vmem [thread:$0]  %s2432_s1, 6144, %s36_s10, [#allocation6], %s2254_s19, %s2254_s19, %s2255_s20  }
  0x14   :  { %s2256_s23 = smov [#allocation8]   ;;  %s2135_s27 = scalar_lea.hbm %s2436_s5, 8192 }
  0x15   :  { %s63_s24 = sshll.u32 %s2256_s23, 4  ;;  %p2136_p8 = scmp.ne.s32.totalorder %s2436_s5, %s2135_s27  ;;  %s64_s24 = int_to_ptr.vmem [resolvable:$true] %s63_s24 }
  0x16   :  { %p2139_p9 = scmp.lt.u32.totalorder %s2135_s27, %s2436_s5 }
  0x18   :  { %p2141_p10 = pnand %p2139_p9, %p2136_p8 }
  0x1a   :  { %2144 = shalt.err (!%p2141_p10)
}
  0x1b   :  { %s2145_s12 = scalar_lea.vmem %s64_s24, 8192  ;;  %p2150_p12 = scmp.lt.s32.totalorder %s64_s24, %s64_s24 }
  0x1c   :  { %p2146_p11 = scmp.ne.s32.totalorder %s64_s24, %s2145_s12  ;;  %p2151_p13 = scmp.lt.s32.totalorder %s2145_s12, %s2145_s12 }
  0x1e   :  { %p2152_p0 = por %p2151_p13, %p2150_p12 }
  0x20   :  { %p2153_p1 = pnand %p2152_p0, %p2146_p11 }
  0x22   :  { %2156 = shalt.err (!%p2153_p1)
}
  0x23   :  { %s2257_s1 = smov 128   ;;  %s2258_s10 = smov 8  }
  0x24   :  { %69 = dma.hbm_to_vmem [thread:$0]  %s2436_s5, 8192, %s64_s24, [#allocation9], %s2257_s1, %s2257_s1, %s2258_s10  }
  0x25   :  { %s2259_s15 = smov [#allocation2]   ;;  %s2157_s21 = scalar_lea.hbm %s2431_s0, 1536 }
  0x26   :  { %s23_s16 = sshll.u32 %s2259_s15, 4  ;;  %p2158_p2 = scmp.ne.s32.totalorder %s2431_s0, %s2157_s21  ;;  %s24_s16 = int_to_ptr.vmem [resolvable:$true] %s23_s16 }
  0x27   :  { %p2161_p3 = scmp.lt.u32.totalorder %s2157_s21, %s2431_s0 }
  0x29   :  { %p2163_p4 = pnand %p2161_p3, %p2158_p2 }
  0x2b   :  { %2166 = shalt.err (!%p2163_p4)
}
  0x2c   :  { %s2167_s27 = scalar_lea.vmem %s24_s16, 1536  ;;  %p2172_p6 = scmp.lt.s32.totalorder %s24_s16, %s24_s16 }
  0x2d   :  { %p2168_p5 = scmp.ne.s32.totalorder %s24_s16, %s2167_s27  ;;  %p2173_p7 = scmp.lt.s32.totalorder %s2167_s27, %s2167_s27 }
  0x2f   :  { %p2174_p8 = por %p2173_p7, %p2172_p6 }
  0x31   :  { %p2175_p9 = pnand %p2174_p8, %p2168_p5 }
  0x33   :  { %2178 = shalt.err (!%p2175_p9)
}
  0x34   :  { %s2260_s5 = smov 768   ;;  %s2261_s24 = smov 48  }
  0x35   :  { %29 = dma.hbm_to_vmem [thread:$0]  %s2431_s0, 1536, %s24_s16, [#allocation3], %s2260_s5, %s2260_s5, %s2261_s24  }
  0x36   :  { %s2262_s30 = smov [#allocation7]   ;;  %s2179_s14 = scalar_lea.hbm %s2434_s3, 4096 }
  0x37   :  { %s49_s11 = sshll.u32 %s2262_s30, 4  ;;  %p2180_p10 = scmp.ne.s32.totalorder %s2434_s3, %s2179_s14  ;;  %s50_s11 = int_to_ptr.vmem [resolvable:$true] %s49_s11 }
  0x38   :  { %p2183_p11 = scmp.lt.u32.totalorder %s2179_s14, %s2434_s3 }
  0x3a   :  { %p2185_p12 = pnand %p2183_p11, %p2180_p10 }
  0x3c   :  { %2188 = shalt.err (!%p2185_p12)
}
  0x3d   :  { %s2189_s22 = scalar_lea.vmem %s50_s11, 4096  ;;  %p2194_p0 = scmp.lt.s32.totalorder %s50_s11, %s50_s11 }
  0x3e   :  { %p2190_p13 = scmp.ne.s32.totalorder %s50_s11, %s2189_s22  ;;  %p2195_p1 = scmp.lt.s32.totalorder %s2189_s22, %s2189_s22 }
  0x40   :  { %p2196_p2 = por %p2195_p1, %p2194_p0 }
  0x42   :  { %p2197_p3 = pnand %p2196_p2, %p2190_p13 }
  0x44   :  { %2200 = shalt.err (!%p2197_p3)
}
  0x45   :  { %s2263_s0 = smov 256   ;;  %s2264_s16 = smov 16  }
  0x46   :  { %55 = dma.hbm_to_vmem [thread:$0]  %s2434_s3, 4096, %s50_s11, [#allocation6], %s2263_s0, %s2263_s0, %s2264_s16  }
  0x47   :  { %s2265_s26 = smov [#allocation10]   ;;  %s2201_s28 = scalar_lea.hbm %s2438_s7, 2048 }
  0x48   :  { %s77_s27 = sshll.u32 %s2265_s26, 4  ;;  %p2202_p4 = scmp.ne.s32.totalorder %s2438_s7, %s2201_s28  ;;  %s78_s27 = int_to_ptr.vmem [resolvable:$true] %s77_s27 }
  0x49   :  { %p2205_p5 = scmp.lt.u32.totalorder %s2201_s28, %s2438_s7 }
  0x4b   :  { %p2207_p6 = pnand %p2205_p5, %p2202_p4 }
  0x4d   :  { %2210 = shalt.err (!%p2207_p6)
}
  0x4e   :  { %s2211_s14 = scalar_lea.vmem %s78_s27, 2048  ;;  %p2216_p8 = scmp.lt.s32.totalorder %s78_s27, %s78_s27 }
  0x4f   :  { %p2212_p7 = scmp.ne.s32.totalorder %s78_s27, %s2211_s14  ;;  %p2217_p9 = scmp.lt.s32.totalorder %s2211_s14, %s2211_s14 }
  0x51   :  { %p2218_p10 = por %p2217_p9, %p2216_p8 }
  0x53   :  { %p2219_p11 = pnand %p2218_p10, %p2212_p7 }
  0x55   :  { %2222 = shalt.err (!%p2219_p11)
}
  0x56   :  { %83 = dma.hbm_to_vmem [thread:$0]  %s2438_s7, 2048, %s78_s27, [#allocation9], %s2254_s19, %s2254_s19, %s2255_s20  }
  0x57   :  { %2245 = dma.done.wait [#allocation3], 1536  }
  0x58   :  { %2246 = vsyncadd [#allocation3], 4294965760 }
  0x59   :  { %2247 = dma.done.wait [#allocation6], 10240  }
  0x5a   :  { %2248 = vsyncadd [#allocation6], 4294957056 }
  0x5b   :  { %2249 = dma.done.wait [#allocation9], 10240  }
  0x5c   :  { %2250 = vsyncadd [#allocation9], 4294957056  ;;  %v1905_v0 = vld [vmem:[#allocation5 + $0x40] sm:$0xff]   ;;  %v1907_v2 = vld [vmem:[#allocation5 + $0x48] sm:$0xff]   ;;  %s2267_s18 = smov [#allocation11]  }
  0x5d   :  { %v1906_v1 = vld [vmem:[#allocation5] sm:$0xff]   ;;  %1794 = vmatprep.subr.bf16.mxu0 %v1905_v0  ;;  %v1908_v3 = vld [vmem:[#allocation5 + $0x8] sm:$0xff]   ;;  %v1909_v4 = vld [vmem:[#allocation5 + $0x50] sm:$0xff]   ;;  %s1618_s21 = sshll.u32 %s2267_s18, 4  ;;  %s1619_s21 = int_to_ptr.vmem [resolvable:$true] %s1618_s21 }
  0x5e   :  { %1795 = vmatpush3.bf16.msra.mxu0 %v1906_v1  ;;  %v1910_v5 = vld [vmem:[#allocation5 + $0x10] sm:$0xff]   ;;  %v1911_v6 = vld [vmem:[#allocation5 + $0x58] sm:$0xff]   ;;  %v1913_v8 = vld [vmem:[#allocation5 + $0x60] sm:$0xff]   ;;  %s2223_s22 = scalar_lea.vmem %s1619_s21, 256  ;;  %p2228_p13 = scmp.lt.s32.totalorder %s1619_s21, %s1619_s21 }
  0x5f   :  { %1796 = vmatprep.subr.bf16.mxu0 %v1907_v2  ;;  %v1912_v7 = vld [vmem:[#allocation5 + $0x18] sm:$0xff]   ;;  %v1914_v9 = vld [vmem:[#allocation5 + $0x20] sm:$0xff]   ;;  %v1915_v10 = vld [vmem:[#allocation5 + $0x68] sm:$0xff]   ;;  %p2224_p12 = scmp.ne.s32.totalorder %s1619_s21, %s2223_s22  ;;  %p2229_p0 = scmp.lt.s32.totalorder %s2223_s22, %s2223_s22 }
  0x60   :  { %v103_v11 = vld [vmem:[#allocation2 + $0x8] sm:$0xff]  ;;  %v109_v12 = vld [vmem:[#allocation2 + $0x38] sm:$0xff]  ;;  %v1917_v15 = vld [vmem:[#allocation5 + $0x70] sm:$0xff]  }
  0x61   :  { %v115_v13 = vpack.c.bf16 %v109_v12, %v103_v11  ;;  %v1916_v14 = vld [vmem:[#allocation5 + $0x28] sm:$0xff]   ;;  %v1918_v16 = vld [vmem:[#allocation5 + $0x30] sm:$0xff]   ;;  %v1919_v17 = vld [vmem:[#allocation5 + $0x78] sm:$0xff]   ;;  %p2230_p1 = por %p2229_p0, %p2228_p13 }
  0x62   :  { %1797 = vmatpush3.bf16.msra.mxu0 %v1908_v3  ;;  %v1920_v18 = vld [vmem:[#allocation5 + $0x38] sm:$0xff]   ;;  %v102_v19 = vld [vmem:[#allocation2] sm:$0xff]  ;;  %v108_v20 = vld [vmem:[#allocation2 + $0x30] sm:$0xff] }
  0x63   :  { %1798 = vmatprep.subr.bf16.mxu0 %v1909_v4  ;;  %543 = vmatprep.mubr.bf16.mxu0 %v115_v13  ;;  %v1921_v21 = vld [vmem:[#allocation5 + $0xc0] sm:$0xff]   ;;  %v114_v22 = vpack.c.bf16 %v108_v20, %v102_v19  ;;  %v1923_v24 = vld [vmem:[#allocation5 + $0xc8] sm:$0xff]   ;;  %v105_v25 = vld [vmem:[#allocation2 + $0x18] sm:$0xff]  ;;  %p2231_p2 = pnand %p2230_p1, %p2224_p12 }
  0x64   :  { %v1922_v23 = vld [vmem:[#allocation5 + $0x80] sm:$0xff]   ;;  %v111_v26 = vld [vmem:[#allocation2 + $0x48] sm:$0xff]  ;;  %v1925_v29 = vld [vmem:[#allocation5 + $0xd0] sm:$0xff]  }
  0x65   :  { %v117_v27 = vpack.c.bf16 %v111_v26, %v105_v25  ;;  %v1924_v28 = vld [vmem:[#allocation5 + $0x88] sm:$0xff]   ;;  %v1926_v30 = vld [vmem:[#allocation5 + $0x90] sm:$0xff]   ;;  %v1927_v31 = vld [vmem:[#allocation5 + $0xd8] sm:$0xff]  }
  0x66   :  { %1799 = vmatpush3.bf16.msra.mxu0 %v1910_v5  ;;  %v1928_v32 = vld [vmem:[#allocation5 + $0x98] sm:$0xff]   ;;  %v1929_v33 = vld [vmem:[#allocation5 + $0xe0] sm:$0xff]   ;;  %v1931_v35 = vld [vmem:[#allocation5 + $0xe8] sm:$0xff]  }
  0x67   :  { %1800 = vmatprep.subr.bf16.mxu0 %v1911_v6  ;;  %v1930_v34 = vld [vmem:[#allocation5 + $0xa0] sm:$0xff]   ;;  %v1932_v36 = vld [vmem:[#allocation5 + $0xa8] sm:$0xff]   ;;  %v1933_v37 = vld [vmem:[#allocation5 + $0xf0] sm:$0xff]  }
  0x68   :  { %v1934_v38 = vld [vmem:[#allocation5 + $0xb0] sm:$0xff]   ;;  %v1935_v39 = vld [vmem:[#allocation5 + $0xf8] sm:$0xff]   ;;  %v110_v42 = vld [vmem:[#allocation2 + $0x40] sm:$0xff] }
  0x69   :  { %v1936_v40 = vld [vmem:[#allocation5 + $0xb8] sm:$0xff]   ;;  %v104_v41 = vld [vmem:[#allocation2 + $0x10] sm:$0xff]  ;;  %v1937_v43 = vld [vmem:[#allocation5 + $0x140] sm:$0xff]  }
  0x6a   :  { %1801 = vmatpush3.bf16.msra.mxu0 %v1912_v7  ;;  %v107_v44 = vld [vmem:[#allocation2 + $0x28] sm:$0xff]  ;;  %v113_v45 = vld [vmem:[#allocation2 + $0x58] sm:$0xff]  ;;  %v1938_v46 = vld [vmem:[#allocation5 + $0x100] sm:$0xff]   ;;  %v116_v47 = vpack.c.bf16 %v110_v42, %v104_v41 }
  0x6b   :  { %1802 = vmatprep.subr.bf16.mxu0 %v1913_v8  ;;  %v1939_v48 = vld [vmem:[#allocation5 + $0x148] sm:$0xff]   ;;  %v119_v49 = vpack.c.bf16 %v113_v45, %v107_v44  ;;  %v1941_v51 = vld [vmem:[#allocation5 + $0x150] sm:$0xff]   ;;  %v1943_v53 = vld [vmem:[#allocation5 + $0x158] sm:$0xff]  }
  0x6c   :  { %v1940_v50 = vld [vmem:[#allocation5 + $0x108] sm:$0xff]   ;;  %v1942_v52 = vld [vmem:[#allocation5 + $0x110] sm:$0xff]   ;;  %v1944_v54 = vld [vmem:[#allocation5 + $0x118] sm:$0xff]  }
  0x6d   :  { %v1945_v55 = vld [vmem:[#allocation5 + $0x160] sm:$0xff]   ;;  %v1947_v57 = vld [vmem:[#allocation5 + $0x168] sm:$0xff]   ;;  %v1949_v59 = vld [vmem:[#allocation5 + $0x170] sm:$0xff]  }
  0x6e   :  { %1803 = vmatpush3.bf16.msra.mxu0 %v1914_v9  ;;  %v1946_v56 = vld [vmem:[#allocation5 + $0x120] sm:$0xff]   ;;  %v1948_v58 = vld [vmem:[#allocation5 + $0x128] sm:$0xff]   ;;  %v1950_v60 = vld [vmem:[#allocation5 + $0x130] sm:$0xff]  }
  0x6f   :  { %1804 = vmatprep.subr.bf16.mxu0 %v1915_v10  ;;  %v1951_v61 = vld [vmem:[#allocation5 + $0x178] sm:$0xff]   ;;  %v106_v63 = vld [vmem:[#allocation2 + $0x20] sm:$0xff]  ;;  %v112_v0 = vld [vmem:[#allocation2 + $0x50] sm:$0xff] }
  0x70   :  { %v1952_v62 = vld [vmem:[#allocation5 + $0x138] sm:$0xff]   ;;  %v118_v1 = vpack.c.bf16 %v112_v0, %v106_v63  ;;  %v1953_v2 = vld [vmem:[#allocation7 + $0x4] ss:$16 sps:$4 sm:$0xff]   ;;  %v1958_v5 = vld [vmem:[#allocation7] ss:$16 sps:$4 sm:$0xff]  }
  0x71   :  { %v1955_v3 = vld [vmem:[#allocation7 + $0x8] ss:$16 sps:$4 sm:$0xff]   ;;  %v1957_v4 = vld [vmem:[#allocation7 + $0xc] ss:$16 sps:$4 sm:$0xff]   ;;  %v1959_v6 = vld [vmem:[#allocation7 + $0x24] ss:$16 sps:$4 sm:$0xff]   ;;  %849 = vmatprep.subr.bf16.mxu1 %v1953_v2 }
  0x72   :  { %1805 = vmatpush3.bf16.msra.mxu0 %v1916_v14  ;;  %v1963_v7 = vld [vmem:[#allocation7 + $0x2c] ss:$16 sps:$4 sm:$0xff]   ;;  %850 = vmatpush1.bf16.msra.mxu1 %v1958_v5  ;;  %v1961_v8 = vld [vmem:[#allocation7 + $0x28] ss:$16 sps:$4 sm:$0xff]   ;;  %v1964_v9 = vld [vmem:[#allocation7 + $0x20] ss:$16 sps:$4 sm:$0xff]  }
  0x73   :  { %1806 = vmatprep.subr.bf16.mxu0 %v1917_v15  ;;  %851 = vmatprep.subr.bf16.mxu1 %v1959_v6  ;;  %v1965_v10 = vld [vmem:[#allocation7 + $0x44] ss:$16 sps:$4 sm:$0xff]   ;;  %v1969_v11 = vld [vmem:[#allocation7 + $0x4c] ss:$16 sps:$4 sm:$0xff]   ;;  %v1967_v12 = vld [vmem:[#allocation7 + $0x48] ss:$16 sps:$4 sm:$0xff]  }
  0x74   :  { %v1970_v13 = vld [vmem:[#allocation7 + $0x40] ss:$16 sps:$4 sm:$0xff]   ;;  %v1971_v14 = vld [vmem:[#allocation7 + $0x64] ss:$16 sps:$4 sm:$0xff]   ;;  %v1975_v15 = vld [vmem:[#allocation7 + $0x6c] ss:$16 sps:$4 sm:$0xff]  }
  0x75   :  { %v1981_v19 = vld [vmem:[#allocation7 + $0x8c] ss:$16 sps:$4 sm:$0xff]   ;;  %v1979_v20 = vld [vmem:[#allocation7 + $0x88] ss:$16 sps:$4 sm:$0xff]   ;;  %v1988_v25 = vld [vmem:[#allocation7 + $0xa0] ss:$16 sps:$4 sm:$0xff]  }
  0x76   :  { %1807 = vmatpush3.bf16.msra.mxu0 %v1918_v16  ;;  %852 = vmatpush1.bf16.msra.mxu1 %v1964_v9  ;;  %v1973_v16 = vld [vmem:[#allocation7 + $0x68] ss:$16 sps:$4 sm:$0xff]   ;;  %v1989_v26 = vld [vmem:[#allocation7 + $0xc4] ss:$16 sps:$4 sm:$0xff]   ;;  %v1632_v42 = vld [vmem:[%s2433_s2] ss:$0 sm:$0xff] }
  0x77   :  { %1808 = vmatprep.subr.bf16.mxu0 %v1919_v17  ;;  %853 = vmatprep.subr.bf16.mxu1 %v1965_v10  ;;  %v1976_v17 = vld [vmem:[#allocation7 + $0x60] ss:$16 sps:$4 sm:$0xff]   ;;  %v2006_v63 = vld [vmem:[#allocation8 + $0x14] ss:$8 sps:$4 sm:$0xff]   ;;  %v2015_v5 = vld [vmem:[#allocation8 + $0x44] ss:$8 sps:$4 sm:$0xff]  }
  0x78   :  { %v2004_v0 = vld [vmem:[#allocation8 + $0x10] ss:$8 sps:$4 sm:$0xff]   ;;  %v2007_v2 = vld [vmem:[#allocation8 + $0x20] ss:$8 sps:$4 sm:$0xff]   ;;  %v2021_v9 = vld [vmem:[#allocation8 + $0x64] ss:$8 sps:$4 sm:$0xff]  }
  0x79   :  { %v2013_v6 = vld [vmem:[#allocation8 + $0x40] ss:$8 sps:$4 sm:$0xff]  }
  0x7a   :  { %1809 = vmatpush3.bf16.msra.mxu0 %v1920_v18  ;;  %854 = vmatpush1.bf16.msra.mxu1 %v1970_v13  ;;  %v1977_v18 = vld [vmem:[#allocation7 + $0x84] ss:$16 sps:$4 sm:$0xff]   ;;  %v2019_v10 = vld [vmem:[#allocation8 + $0x60] ss:$8 sps:$4 sm:$0xff]  }
  0x7b   :  { %1816 = vmatprep.subr.bf16.mxu0 %v1921_v21  ;;  %855 = vmatprep.subr.bf16.mxu1 %v1971_v14  ;;  %v1982_v21 = vld [vmem:[#allocation7 + $0x80] ss:$16 sps:$4 sm:$0xff]   ;;  %v2027_v13 = vld [vmem:[#allocation8 + $0x84] ss:$8 sps:$4 sm:$0xff]  }
  0x7c   :  { %v2025_v14 = vld [vmem:[#allocation8 + $0x80] ss:$8 sps:$4 sm:$0xff]  }
  0x7d   :  { %544 = vmatmul.mubr.bf16.vlgmr.msra.gmra.mrb[0].mxu0 %v114_v22  ;;  %v1983_v22 = vld [vmem:[#allocation7 + $0xa4] ss:$16 sps:$4 sm:$0xff]  }
  0x7e   :  { %1817 = vmatpush3.bf16.msra.mxu0 %v1922_v23  ;;  %584 = vmatprep.mubr.bf16.mxu0 %v117_v27  ;;  %v1987_v23 = vld [vmem:[#allocation7 + $0xac] ss:$16 sps:$4 sm:$0xff]  }
  0x7f   :  { %1818 = vmatprep.subr.bf16.mxu0 %v1923_v24  ;;  %856 = vmatpush1.bf16.msra.mxu1 %v1976_v17  ;;  %v1985_v24 = vld [vmem:[#allocation7 + $0xa8] ss:$16 sps:$4 sm:$0xff]   ;;  %v1993_v27 = vld [vmem:[#allocation7 + $0xcc] ss:$16 sps:$4 sm:$0xff]  }
  0x80   :  { %857 = vmatprep.subr.bf16.mxu1 %v1977_v18  ;;  %v2033_v17 = vld [vmem:[#allocation8 + $0xa4] ss:$8 sps:$4 sm:$0xff]   ;;  %v2031_v18 = vld [vmem:[#allocation8 + $0xa0] ss:$8 sps:$4 sm:$0xff]  }
  0x82   :  { %1819 = vmatpush3.bf16.msra.mxu0 %v1924_v28  ;;  %v1991_v28 = vld [vmem:[#allocation7 + $0xc8] ss:$16 sps:$4 sm:$0xff]  }
  0x83   :  { %1820 = vmatprep.subr.bf16.mxu0 %v1925_v29  ;;  %858 = vmatpush1.bf16.msra.mxu1 %v1982_v21  ;;  %v1994_v29 = vld [vmem:[#allocation7 + $0xc0] ss:$16 sps:$4 sm:$0xff]   ;;  %v2039_v21 = vld [vmem:[#allocation8 + $0xc4] ss:$8 sps:$4 sm:$0xff]  }
  0x84   :  { %859 = vmatprep.subr.bf16.mxu1 %v1983_v22  ;;  %v2037_v22 = vld [vmem:[#allocation8 + $0xc0] ss:$8 sps:$4 sm:$0xff]  }
  0x86   :  { %1821 = vmatpush3.bf16.msra.mxu0 %v1926_v30  ;;  %v1995_v30 = vld [vmem:[#allocation7 + $0xe4] ss:$16 sps:$4 sm:$0xff]  }
  0x87   :  { %1822 = vmatprep.subr.bf16.mxu0 %v1927_v31  ;;  %860 = vmatpush1.bf16.msra.mxu1 %v1988_v25  ;;  %v1999_v31 = vld [vmem:[#allocation7 + $0xec] ss:$16 sps:$4 sm:$0xff]  }
  0x88   :  { %861 = vmatprep.subr.bf16.mxu1 %v1989_v26  ;;  %v2045_v25 = vld [vmem:[#allocation8 + $0xe4] ss:$8 sps:$4 sm:$0xff]   ;;  %v2043_v26 = vld [vmem:[#allocation8 + $0xe0] ss:$8 sps:$4 sm:$0xff]  }
  0x8a   :  { %1823 = vmatpush3.bf16.msra.mxu0 %v1928_v32  ;;  %v1997_v32 = vld [vmem:[#allocation7 + $0xe8] ss:$16 sps:$4 sm:$0xff]  }
  0x8b   :  { %1824 = vmatprep.subr.bf16.mxu0 %v1929_v33  ;;  %862 = vmatpush1.bf16.msra.mxu1 %v1994_v29  ;;  %v2000_v33 = vld [vmem:[#allocation7 + $0xe0] ss:$16 sps:$4 sm:$0xff]   ;;  %v2051_v29 = vld [vmem:[#allocation8 + $0x104] ss:$8 sps:$4 sm:$0xff]  }
  0x8c   :  { %863 = vmatprep.subr.bf16.mxu1 %v1995_v30  ;;  %v2097_v30 = vld [vmem:[#allocation10 + $0x40] sm:$0xff]  }
  0x8e   :  { %1825 = vmatpush3.bf16.msra.mxu0 %v1930_v34  ;;  %v2266_v34 = vmov 0  }
  0x8f   :  { %1826 = vmatprep.subr.bf16.mxu0 %v1931_v35  ;;  %864 = vmatpush1.bf16.msra.mxu1 %v2000_v33  ;;  %v2003_v35 = vld [vmem:[#allocation8 + $0x4] ss:$8 sps:$4 sm:$0xff]  }
  0x90   :  { %881 = vmatprep.mubr.bf16.mxu1 %v2266_v34  ;;  %1343 = vmatprep.subr.bf16.mxu1 %v2003_v35  ;;  %v2100_v33 = vld [vmem:[#allocation10 + $0x8] sm:$0xff]   ;;  %v2102_v35 = vld [vmem:[#allocation10 + $0x10] sm:$0xff]  }
  0x92   :  { %1827 = vmatpush3.bf16.msra.mxu0 %v1932_v36 }
  0x93   :  { %1828 = vmatprep.subr.bf16.mxu0 %v1933_v37 }
  0x96   :  { %1829 = vmatpush3.bf16.msra.mxu0 %v1934_v38 }
  0x97   :  { %1830 = vmatprep.subr.bf16.mxu0 %v1935_v39 }
  0x9a   :  { %1831 = vmatpush3.bf16.msra.mxu0 %v1936_v40 }
  0x9b   :  { %1838 = vmatprep.subr.bf16.mxu0 %v1937_v43 }
  0x9d   :  { %585 = vmatmul.mubr.bf16.vlgmr.msra.gmra.mrb[4].mxu0 %v116_v47 }
  0x9e   :  { %1839 = vmatpush3.bf16.msra.mxu0 %v1938_v46  ;;  %625 = vmatprep.mubr.bf16.mxu0 %v119_v49 }
  0x9f   :  { %1840 = vmatprep.subr.bf16.mxu0 %v1939_v48 }
  0xa2   :  { %1841 = vmatpush3.bf16.msra.mxu0 %v1940_v50 }
  0xa3   :  { %1842 = vmatprep.subr.bf16.mxu0 %v1941_v51 }
  0xa6   :  { %1843 = vmatpush3.bf16.msra.mxu0 %v1942_v52 }
  0xa7   :  { %1844 = vmatprep.subr.bf16.mxu0 %v1943_v53 }
  0xaa   :  { %1845 = vmatpush3.bf16.msra.mxu0 %v1944_v54 }
  0xab   :  { %1846 = vmatprep.subr.bf16.mxu0 %v1945_v55 }
  0xae   :  { %1847 = vmatpush3.bf16.msra.mxu0 %v1946_v56 }
  0xaf   :  { %1848 = vmatprep.subr.bf16.mxu0 %v1947_v57 }
  0xb2   :  { %1849 = vmatpush3.bf16.msra.mxu0 %v1948_v58 }
  0xb3   :  { %1850 = vmatprep.subr.bf16.mxu0 %v1949_v59 }
  0xb6   :  { %1851 = vmatpush3.bf16.msra.mxu0 %v1950_v60 }
  0xb7   :  { %1852 = vmatprep.subr.bf16.mxu0 %v1951_v61  ;;  %v2001_v61 = vld [vmem:[#allocation8] ss:$8 sps:$4 sm:$0xff]  }
  0xba   :  { %1853 = vmatpush3.bf16.msra.mxu0 %v1952_v62 }
  0xbb   :  { %892 = vmatprep.subr.bf16.mxu0 %v1957_v4  ;;  %v2010_v4 = vld [vmem:[#allocation8 + $0x30] ss:$8 sps:$4 sm:$0xff]  }
  0xbd   :  { %626 = vmatmul.mubr.bf16.vlgmr.msra.gmra.mrb[8].mxu0 %v118_v1  ;;  %v2009_v1 = vld [vmem:[#allocation8 + $0x24] ss:$8 sps:$4 sm:$0xff]  }
  0xbe   :  { %893 = vmatpush1.bf16.msra.mxu0 %v1955_v3  ;;  %924 = vmatprep.mubr.bf16.mxu0 %v2266_v34  ;;  %v2012_v3 = vld [vmem:[#allocation8 + $0x34] ss:$8 sps:$4 sm:$0xff]  }
  0xbf   :  { %894 = vmatprep.subr.bf16.mxu0 %v1963_v7  ;;  %v2018_v7 = vld [vmem:[#allocation8 + $0x54] ss:$8 sps:$4 sm:$0xff]  }
  0xc0   :  { %v2101_v34 = vld [vmem:[#allocation10 + $0x50] sm:$0xff]  }
  0xc2   :  { %895 = vmatpush1.bf16.msra.mxu0 %v1961_v8  ;;  %v2016_v8 = vld [vmem:[#allocation8 + $0x50] ss:$8 sps:$4 sm:$0xff]  }
  0xc3   :  { %896 = vmatprep.subr.bf16.mxu0 %v1969_v11  ;;  %v2024_v11 = vld [vmem:[#allocation8 + $0x74] ss:$8 sps:$4 sm:$0xff]  }
  0xc6   :  { %897 = vmatpush1.bf16.msra.mxu0 %v1967_v12  ;;  %v2022_v12 = vld [vmem:[#allocation8 + $0x70] ss:$8 sps:$4 sm:$0xff]  }
  0xc7   :  { %898 = vmatprep.subr.bf16.mxu0 %v1975_v15  ;;  %v2030_v15 = vld [vmem:[#allocation8 + $0x94] ss:$8 sps:$4 sm:$0xff]  }
  0xca   :  { %899 = vmatpush1.bf16.msra.mxu0 %v1973_v16  ;;  %v2028_v16 = vld [vmem:[#allocation8 + $0x90] ss:$8 sps:$4 sm:$0xff]  }
  0xcb   :  { %900 = vmatprep.subr.bf16.mxu0 %v1981_v19  ;;  %v2036_v19 = vld [vmem:[#allocation8 + $0xb4] ss:$8 sps:$4 sm:$0xff]  }
  0xce   :  { %901 = vmatpush1.bf16.msra.mxu0 %v1979_v20  ;;  %v2034_v20 = vld [vmem:[#allocation8 + $0xb0] ss:$8 sps:$4 sm:$0xff]  }
  0xcf   :  { %902 = vmatprep.subr.bf16.mxu0 %v1987_v23  ;;  %v2042_v23 = vld [vmem:[#allocation8 + $0xd4] ss:$8 sps:$4 sm:$0xff]  }
  0xd2   :  { %903 = vmatpush1.bf16.msra.mxu0 %v1985_v24  ;;  %v2040_v24 = vld [vmem:[#allocation8 + $0xd0] ss:$8 sps:$4 sm:$0xff]  }
  0xd3   :  { %904 = vmatprep.subr.bf16.mxu0 %v1993_v27  ;;  %v2048_v27 = vld [vmem:[#allocation8 + $0xf4] ss:$8 sps:$4 sm:$0xff]  }
  0xd6   :  { %905 = vmatpush1.bf16.msra.mxu0 %v1991_v28  ;;  %v2046_v28 = vld [vmem:[#allocation8 + $0xf0] ss:$8 sps:$4 sm:$0xff]  }
  0xd7   :  { %906 = vmatprep.subr.bf16.mxu0 %v1999_v31  ;;  %v2098_v31 = vld [vmem:[#allocation10] sm:$0xff]  }
  0xda   :  { %907 = vmatpush1.bf16.msra.mxu0 %v1997_v32  ;;  %v2099_v32 = vld [vmem:[#allocation10 + $0x48] sm:$0xff]  }
  0xdb   :  { %1860 = vmatprep.subr.bf16.mxu0 %v2097_v30  ;;  %v2070_v30 = vld [vmem:[#allocation8 + $0x170] ss:$8 sps:$4 sm:$0xff]  }
 0x150   :  { %v1810_v36 = vpop.f32.mrb[0].mxu0 }
 0x151   :  { %v1811_v37 = vpop.f32.mrb[1].mxu0 }
 0x152   :  { %v1812_v38 = vadd.f32 %v1811_v37, %v1810_v36  ;;  %v1813_v39 = vpop.f32.mrb[2].mxu0  ;;  %v2103_v36 = vld [vmem:[#allocation10 + $0x58] sm:$0xff]  }
 0x153   :  { %v1814_v40 = vpop.f32.mrb[3].mxu0  ;;  %v2104_v37 = vld [vmem:[#allocation10 + $0x18] sm:$0xff]  }
 0x154   :  { %v1815_v41 = vadd.f32 %v1814_v40, %v1813_v39  ;;  %v546_v45 = vadd.f32 %v1812_v38, %v1632_v42  ;;  %v2105_v38 = vld [vmem:[#allocation10 + $0x60] sm:$0xff]   ;;  %v2107_v40 = vld [vmem:[#allocation10 + $0x68] sm:$0xff]  }
 0x155   :  { %v2106_v39 = vld [vmem:[#allocation10 + $0x20] sm:$0xff]  }
 0x156   :  { %v549_v49 = vadd.f32 %v1815_v41, %v1632_v42  ;;  %v669_v41 = vlaneseq }
 0x158   :  { %v2390_v42 = vshrl.u32 %v669_v41, 7  ;;  %v2090_v41 = vld [vmem:[#allocation8 + $0x1d4] ss:$8 sps:$4 sm:$0xff]  }
 0x170   :  { %v1832_v43 = vpop.f32.mrb[4].mxu0 }
 0x171   :  { %v1833_v44 = vpop.f32.mrb[5].mxu0 }
 0x172   :  { %v1834_v46 = vadd.f32 %v1833_v44, %v1832_v43  ;;  %v1835_v47 = vpop.f32.mrb[6].mxu0  ;;  %v671_v43 = vsub.s32 0, %v2390_v42  ;;  %v679_v44 = vsub.s32 2, %v2390_v42 }
 0x173   :  { %v1836_v48 = vpop.f32.mrb[7].mxu0 }
 0x174   :  { %v587_v50 = vadd.f32 %v1834_v46, %v546_v45  ;;  %v1837_v51 = vadd.f32 %v1836_v48, %v1835_v47  ;;  %v667_v45 = vld [vmem:[%s2435_s4] sm:$0xf]  ;;  %v675_v46 = vsub.s32 1, %v2390_v42  ;;  %v683_v47 = vsub.s32 3, %v2390_v42 }
 0x175   :  { %v672_v48 = vrot.slane %v667_v45, %v671_v43  ;;  %v1777_v42 = vld [vmem:[%s2439_s8] ss:$0 sm:$0xff] }
 0x176   :  { %v590_v52 = vadd.f32 %v1837_v51, %v549_v49  ;;  %v680_v49 = vrot.slane %v667_v45, %v679_v44  ;;  %v684_v51 = vrot.slane %v667_v45, %v683_v47  ;;  %v2088_v44 = vld [vmem:[#allocation8 + $0x1d0] ss:$8 sps:$4 sm:$0xff]   ;;  %v2091_v47 = vld [vmem:[#allocation8 + $0x1e0] ss:$8 sps:$4 sm:$0xff]  }
 0x190   :  { %v1854_v53 = vpop.f32.mrb[8].mxu0 }
 0x191   :  { %v1855_v54 = vpop.f32.mrb[9].mxu0 }
 0x192   :  { %v1856_v55 = vadd.f32 %v1855_v54, %v1854_v53  ;;  %v1857_v56 = vpop.f32.mrb[10].mxu0 }
 0x193   :  { %v1858_v57 = vpop.f32.mrb[11].mxu0 }
 0x194   :  { %v628_v58 = vadd.f32 %v1856_v55, %v587_v50  ;;  %v1859_v59 = vadd.f32 %v1858_v57, %v1857_v56  ;;  %v676_v50 = vrot.slane %v667_v45, %v675_v46  ;;  %v2093_v45 = vld [vmem:[#allocation8 + $0x1e4] ss:$8 sps:$4 sm:$0xff]  }
 0x196   :  { %v631_v60 = vadd.f32 %v1859_v59, %v590_v52 }
 0x198   :  { %v634_v62 = vpack.c.bf16 %v631_v60, %v628_v58 }
 0x19a   :  { %882 = vmatmul.mubr.bf16.vlgmr.msra.gmra.mrb[0].mxu1 %v634_v62  ;;  %925 = vmatmul.mubr.bf16.vlgmr.msra.gmra.mrb[12].mxu0 %v634_v62 }
 0x19b   :  { %1344 = vmatpush1.bf16.msra.mxu1 %v2001_v61  ;;  %1861 = vmatpush3.bf16.msra.mxu0 %v2098_v31  ;;  %v2075_v31 = vld [vmem:[#allocation8 + $0x184] ss:$8 sps:$4 sm:$0xff]  }
 0x19c   :  { %1345 = vmatprep.subr.bf16.mxu1 %v2006_v63  ;;  %1862 = vmatprep.subr.bf16.mxu0 %v2099_v32  ;;  %v2073_v32 = vld [vmem:[#allocation8 + $0x180] ss:$8 sps:$4 sm:$0xff]  }
 0x19f   :  { %1346 = vmatpush1.bf16.msra.mxu1 %v2004_v0  ;;  %1863 = vmatpush3.bf16.msra.mxu0 %v2100_v33  ;;  %v2078_v33 = vld [vmem:[#allocation8 + $0x194] ss:$8 sps:$4 sm:$0xff]  }
 0x1a0   :  { %1347 = vmatprep.subr.bf16.mxu1 %v2009_v1  ;;  %1864 = vmatprep.subr.bf16.mxu0 %v2101_v34  ;;  %v2076_v34 = vld [vmem:[#allocation8 + $0x190] ss:$8 sps:$4 sm:$0xff]  }
 0x1a3   :  { %1348 = vmatpush1.bf16.msra.mxu1 %v2007_v2  ;;  %1865 = vmatpush3.bf16.msra.mxu0 %v2102_v35  ;;  %v2081_v35 = vld [vmem:[#allocation8 + $0x1a4] ss:$8 sps:$4 sm:$0xff]  }
 0x1a4   :  { %1349 = vmatprep.subr.bf16.mxu1 %v2012_v3  ;;  %1866 = vmatprep.subr.bf16.mxu0 %v2103_v36  ;;  %v2079_v36 = vld [vmem:[#allocation8 + $0x1a0] ss:$8 sps:$4 sm:$0xff]  }
 0x1a7   :  { %1350 = vmatpush1.bf16.msra.mxu1 %v2010_v4  ;;  %1867 = vmatpush3.bf16.msra.mxu0 %v2104_v37  ;;  %v2084_v37 = vld [vmem:[#allocation8 + $0x1b4] ss:$8 sps:$4 sm:$0xff]  }
 0x1a8   :  { %1351 = vmatprep.subr.bf16.mxu1 %v2015_v5  ;;  %1868 = vmatprep.subr.bf16.mxu0 %v2105_v38  ;;  %v2082_v38 = vld [vmem:[#allocation8 + $0x1b0] ss:$8 sps:$4 sm:$0xff]  }
 0x1ab   :  { %1352 = vmatpush1.bf16.msra.mxu1 %v2013_v6  ;;  %1869 = vmatpush3.bf16.msra.mxu0 %v2106_v39  ;;  %v2087_v39 = vld [vmem:[#allocation8 + $0x1c4] ss:$8 sps:$4 sm:$0xff]  }
 0x1ac   :  { %1353 = vmatprep.subr.bf16.mxu1 %v2018_v7  ;;  %1870 = vmatprep.subr.bf16.mxu0 %v2107_v40  ;;  %v2085_v40 = vld [vmem:[#allocation8 + $0x1c0] ss:$8 sps:$4 sm:$0xff]  }
 0x1af   :  { %1354 = vmatpush1.bf16.msra.mxu1 %v2016_v8 }
 0x1b0   :  { %1355 = vmatprep.subr.bf16.mxu1 %v2021_v9 }
 0x1b3   :  { %1356 = vmatpush1.bf16.msra.mxu1 %v2019_v10 }
 0x1b4   :  { %1357 = vmatprep.subr.bf16.mxu1 %v2024_v11 }
 0x1b7   :  { %1358 = vmatpush1.bf16.msra.mxu1 %v2022_v12 }
 0x1b8   :  { %1359 = vmatprep.subr.bf16.mxu1 %v2027_v13 }
 0x1bb   :  { %1360 = vmatpush1.bf16.msra.mxu1 %v2025_v14 }
 0x1bc   :  { %1361 = vmatprep.subr.bf16.mxu1 %v2030_v15 }
 0x1bf   :  { %1362 = vmatpush1.bf16.msra.mxu1 %v2028_v16  ;;  %v2049_v16 = vld [vmem:[#allocation8 + $0x100] ss:$8 sps:$4 sm:$0xff]  }
 0x1c0   :  { %1363 = vmatprep.subr.bf16.mxu1 %v2033_v17  ;;  %v2054_v17 = vld [vmem:[#allocation8 + $0x114] ss:$8 sps:$4 sm:$0xff]  }
 0x1c3   :  { %1364 = vmatpush1.bf16.msra.mxu1 %v2031_v18  ;;  %v2052_v18 = vld [vmem:[#allocation8 + $0x110] ss:$8 sps:$4 sm:$0xff]  }
 0x1c4   :  { %1365 = vmatprep.subr.bf16.mxu1 %v2036_v19  ;;  %v2057_v19 = vld [vmem:[#allocation8 + $0x124] ss:$8 sps:$4 sm:$0xff]  }
 0x1c7   :  { %1366 = vmatpush1.bf16.msra.mxu1 %v2034_v20  ;;  %v2055_v20 = vld [vmem:[#allocation8 + $0x120] ss:$8 sps:$4 sm:$0xff]  }
 0x1c8   :  { %1367 = vmatprep.subr.bf16.mxu1 %v2039_v21  ;;  %v2060_v21 = vld [vmem:[#allocation8 + $0x134] ss:$8 sps:$4 sm:$0xff]  }
 0x1cb   :  { %1368 = vmatpush1.bf16.msra.mxu1 %v2037_v22  ;;  %v2058_v22 = vld [vmem:[#allocation8 + $0x130] ss:$8 sps:$4 sm:$0xff]  }
 0x1cc   :  { %1369 = vmatprep.subr.bf16.mxu1 %v2042_v23  ;;  %v2063_v23 = vld [vmem:[#allocation8 + $0x144] ss:$8 sps:$4 sm:$0xff]  }
 0x1cf   :  { %1370 = vmatpush1.bf16.msra.mxu1 %v2040_v24  ;;  %v2061_v24 = vld [vmem:[#allocation8 + $0x140] ss:$8 sps:$4 sm:$0xff]  }
 0x1d0   :  { %1371 = vmatprep.subr.bf16.mxu1 %v2045_v25  ;;  %v2066_v25 = vld [vmem:[#allocation8 + $0x154] ss:$8 sps:$4 sm:$0xff]  }
 0x1d3   :  { %1372 = vmatpush1.bf16.msra.mxu1 %v2043_v26  ;;  %v2064_v26 = vld [vmem:[#allocation8 + $0x150] ss:$8 sps:$4 sm:$0xff]  }
 0x1d4   :  { %1373 = vmatprep.subr.bf16.mxu1 %v2048_v27  ;;  %v2069_v27 = vld [vmem:[#allocation8 + $0x164] ss:$8 sps:$4 sm:$0xff]  }
 0x1d7   :  { %1374 = vmatpush1.bf16.msra.mxu1 %v2046_v28  ;;  %v2067_v28 = vld [vmem:[#allocation8 + $0x160] ss:$8 sps:$4 sm:$0xff]  }
 0x1d8   :  { %1386 = vmatprep.subr.bf16.mxu1 %v2051_v29  ;;  %v2072_v29 = vld [vmem:[#allocation8 + $0x174] ss:$8 sps:$4 sm:$0xff]  }
 0x26d   :  { %v883_v52 = vpop.f32.mrb[0].mxu1  ;;  %v926_v53 = vpop.f32.mrb[12].mxu0 }
 0x26e   :  { %v884_v54 = vadd.f32 %v883_v52, %v672_v48  ;;  %v927_v55 = vadd.f32 %v926_v53, %v680_v49  ;;  %v885_v56 = vpop.f32.mrb[1].mxu1  ;;  %v928_v57 = vpop.f32.mrb[13].mxu0  ;;  %v2110_v52 = vld [vmem:[#allocation10 + $0x30] sm:$0xff]   ;;  %v2111_v53 = vld [vmem:[#allocation10 + $0x78] sm:$0xff]  }
 0x26f   :  { %v886_v58 = vadd.f32 %v885_v56, %v676_v50  ;;  %v929_v59 = vadd.f32 %v928_v57, %v684_v51  ;;  %v887_v60 = vpop.f32.mrb[2].mxu1  ;;  %v930_v61 = vpop.f32.mrb[14].mxu0 }
 0x270   :  { %v888_v62 = vadd.f32 %v887_v60, %v672_v48  ;;  %v931_v63 = vadd.f32 %v930_v61, %v680_v49  ;;  %v889_v0 = vpop.f32.mrb[3].mxu1  ;;  %v932_v1 = vpop.f32.mrb[15].mxu0  ;;  %v935_v4 = vmax.f32 %v884_v54, 0.0  ;;  %v937_v5 = vmax.f32 %v927_v55, 0.0  ;;  %v2096_v48 = vld [vmem:[#allocation8 + $0x1f4] ss:$8 sps:$4 sm:$0xff]  }
 0x271   :  { %v890_v2 = vadd.f32 %v889_v0, %v676_v50  ;;  %v933_v3 = vadd.f32 %v932_v1, %v684_v51  ;;  %v936_v8 = vmax.f32 %v886_v58, 0.0  ;;  %v938_v9 = vmax.f32 %v929_v59, 0.0  ;;  %v2094_v49 = vld [vmem:[#allocation8 + $0x1f0] ss:$8 sps:$4 sm:$0xff]   ;;  %v2108_v50 = vld [vmem:[#allocation10 + $0x28] sm:$0xff]  }
 0x272   :  { %v939_v6 = vmax.f32 %v888_v62, 0.0  ;;  %v941_v7 = vmax.f32 %v931_v63, 0.0  ;;  %1871 = vmatpush3.bf16.msra.mxu0 %v2108_v50  ;;  %v2109_v51 = vld [vmem:[#allocation10 + $0x70] sm:$0xff]   ;;  %v2112_v54 = vld [vmem:[#allocation10 + $0x38] sm:$0xff]   ;;  %v1011_v55 = vld [vmem:[%s2437_s6] sm:$0x3] }
 0x273   :  { %v940_v10 = vmax.f32 %v890_v2, 0.0  ;;  %v942_v11 = vmax.f32 %v933_v3, 0.0  ;;  %1872 = vmatprep.subr.bf16.mxu0 %v2109_v51  ;;  %v1016_v56 = vrot.slane %v1011_v55, %v671_v43  ;;  %v1020_v57 = vrot.slane %v1011_v55, %v675_v46 }
 0x274   :  { %v943_v12 = vpack.c.bf16 %v939_v6, %v935_v4  ;;  %v2403_v13 = vpack.c.bf16 %v941_v7, %v937_v5 }
 0x275   :  { %v944_v14 = vpack.c.bf16 %v940_v10, %v936_v8  ;;  %v946_v15 = vpack.c.bf16 %v942_v11, %v938_v9 }
 0x276   :  { %1873 = vmatpush3.bf16.msra.mxu0 %v2110_v52 }
 0x277   :  { %1375 = vmatprep.mubr.bf16.mxu1 %v944_v14  ;;  %1874 = vmatprep.subr.bf16.mxu0 %v2111_v53 }
 0x278   :  { %1376 = vmatmul.mubr.bf16.vlgmr.msra.gmra.mrb[4].mxu1 %v943_v12 }
 0x279   :  { %1387 = vmatpush1.bf16.msra.mxu1 %v2049_v16  ;;  %1418 = vmatprep.mubr.bf16.mxu1 %v946_v15 }
 0x27a   :  { %1388 = vmatprep.subr.bf16.mxu1 %v2054_v17  ;;  %1875 = vmatpush3.bf16.msra.mxu0 %v2112_v54 }
 0x27d   :  { %1389 = vmatpush1.bf16.msra.mxu1 %v2052_v18 }
 0x27e   :  { %1390 = vmatprep.subr.bf16.mxu1 %v2057_v19 }
 0x281   :  { %1391 = vmatpush1.bf16.msra.mxu1 %v2055_v20 }
 0x282   :  { %1392 = vmatprep.subr.bf16.mxu1 %v2060_v21 }
 0x285   :  { %1393 = vmatpush1.bf16.msra.mxu1 %v2058_v22 }
 0x286   :  { %1394 = vmatprep.subr.bf16.mxu1 %v2063_v23 }
 0x289   :  { %1395 = vmatpush1.bf16.msra.mxu1 %v2061_v24 }
 0x28a   :  { %1396 = vmatprep.subr.bf16.mxu1 %v2066_v25 }
 0x28d   :  { %1397 = vmatpush1.bf16.msra.mxu1 %v2064_v26 }
 0x28e   :  { %1398 = vmatprep.subr.bf16.mxu1 %v2069_v27 }
 0x291   :  { %1399 = vmatpush1.bf16.msra.mxu1 %v2067_v28 }
 0x292   :  { %1400 = vmatprep.subr.bf16.mxu1 %v2072_v29 }
 0x295   :  { %1401 = vmatpush1.bf16.msra.mxu1 %v2070_v30 }
 0x296   :  { %1402 = vmatprep.subr.bf16.mxu1 %v2075_v31 }
 0x299   :  { %1403 = vmatpush1.bf16.msra.mxu1 %v2073_v32 }
 0x29a   :  { %1404 = vmatprep.subr.bf16.mxu1 %v2078_v33 }
 0x29d   :  { %1405 = vmatpush1.bf16.msra.mxu1 %v2076_v34 }
 0x29e   :  { %1406 = vmatprep.subr.bf16.mxu1 %v2081_v35 }
 0x2a1   :  { %1407 = vmatpush1.bf16.msra.mxu1 %v2079_v36 }
 0x2a2   :  { %1408 = vmatprep.subr.bf16.mxu1 %v2084_v37 }
 0x2a5   :  { %1409 = vmatpush1.bf16.msra.mxu1 %v2082_v38 }
 0x2a6   :  { %1410 = vmatprep.subr.bf16.mxu1 %v2087_v39 }
 0x2a9   :  { %1411 = vmatpush1.bf16.msra.mxu1 %v2085_v40 }
 0x2aa   :  { %1412 = vmatprep.subr.bf16.mxu1 %v2090_v41 }
 0x2ad   :  { %1413 = vmatpush1.bf16.msra.mxu1 %v2088_v44 }
 0x2ae   :  { %1414 = vmatprep.subr.bf16.mxu1 %v2093_v45 }
 0x2b1   :  { %1415 = vmatpush1.bf16.msra.mxu1 %v2091_v47 }
 0x2b2   :  { %1416 = vmatprep.subr.bf16.mxu1 %v2096_v48 }
 0x2b5   :  { %1417 = vmatpush1.bf16.msra.mxu1 %v2094_v49 }
 0x2b8   :  { %1419 = vmatmul.mubr.bf16.vlgmr.msra.gmra.mrb[4].mxu1 %v2403_v13 }
 0x38b   :  { %v1420_v58 = vpop.f32.mrb[4].mxu1 }
 0x38c   :  { %v1882_v59 = vadd.f32 %v1420_v58, %v1016_v56  ;;  %v1422_v60 = vpop.f32.mrb[5].mxu1 }
 0x38d   :  { %v1883_v61 = vadd.f32 %v1422_v60, %v1020_v57  ;;  %v1424_v62 = vpop.f32.mrb[6].mxu1 }
 0x38e   :  { %v1884_v63 = vadd.f32 %v1424_v62, %v1016_v56  ;;  %v1426_v0 = vpop.f32.mrb[7].mxu1  ;;  %v1429_v2 = vmax.f32 %v1882_v59, 0.0 }
 0x38f   :  { %v1885_v1 = vadd.f32 %v1426_v0, %v1020_v57  ;;  %v1430_v4 = vmax.f32 %v1883_v61, 0.0 }
 0x390   :  { %v1431_v3 = vmax.f32 %v1884_v63, 0.0 }
 0x391   :  { %v1432_v5 = vmax.f32 %v1885_v1, 0.0 }
 0x392   :  { %v1433_v6 = vpack.c.bf16 %v1431_v3, %v1429_v2 }
 0x393   :  { %v1434_v7 = vpack.c.bf16 %v1432_v5, %v1430_v4 }
 0x395   :  { %1602 = vmatprep.mubr.bf16.mxu0 %v1434_v7 }
 0x396   :  { %1603 = vmatmul.mubr.bf16.vlgmr.msra.gmra.mrb[16].mxu0 %v1433_v6 }
 0x469   :  { %v1876_v43 = vpop.f32.mrb[16].mxu0 }
 0x46a   :  { %v1877_v46 = vpop.f32.mrb[17].mxu0 }
 0x46b   :  { %v1878_v8 = vadd.f32 %v1877_v46, %v1876_v43  ;;  %v1879_v9 = vpop.f32.mrb[18].mxu0 }
 0x46c   :  { %v1880_v10 = vpop.f32.mrb[19].mxu0 }
 0x46d   :  { %v1605_v11 = vadd.f32 %v1878_v8, %v1777_v42  ;;  %v1881_v12 = vadd.f32 %v1880_v10, %v1879_v9 }
 0x46f   :  { %1611 = vst [vmem:[#allocation11] sm:$0xff] %v1605_v11  ;;  %v1608_v13 = vadd.f32 %v1881_v12, %v1777_v42 }
 0x471   :  { %1612 = vst [vmem:[#allocation11 + $0x8] sm:$0xff] %v1608_v13 }
 0x472   :  { %2234 = shalt.err (!%p2231_p2)
}
 0x473   :  { %s2235_s16 = scalar_lea.hbm %s2440_s9, 256 }
 0x474   :  { %p2236_p3 = scmp.ne.s32.totalorder %s2440_s9, %s2235_s16  ;;  %p2239_p4 = scmp.lt.u32.totalorder %s2235_s16, %s2440_s9 }
 0x476   :  { %p2241_p5 = pnand %p2239_p4, %p2236_p3 }
 0x478   :  { %2244 = shalt.err (!%p2241_p5)
}
 0x479   :  { %1624 = dma.vmem_to_hbm [thread:$0]  %s1619_s21, 256, %s2440_s9, [#allocation4], %s2257_s1, %s2257_s1, %s2258_s10  }
 0x47a   :  { %2251 = dma.done.wait [#allocation4], 256  }
 0x47b   :  { %2252 = vsyncadd [#allocation4], 4294967040 }
 0x47c   :  { %1628 = vsyncpa [#allocation3], 1 }
 0x47d   :  { %1629 = vsyncpa [#allocation6], 1 }
 0x47e   :  { %1630 = vsyncpa [#allocation9], 1 }
 0x47f   :  { %1631 = vsyncpa [#allocation4], 1 }

</bundles_post_ra>
